<compile_context>
chip_gen: v6e
topology: v6e:2x2x1
jax: 0.10.0
libtpu: 0.0.40
codegen_flags: <defaults>
</compile_context>

<pallas_src>
import jax
import jax.numpy as jnp
from jax.experimental import pallas as pl
from jax.experimental.pallas import tpu as pltpu


def _model_kernel(w_ref, b_ref, x_ref, o_ref):
    # w_ref : SMEM (4,) f32 = [w00, w01, w10, w11]  (row-major Linear weight)
    # b_ref : SMEM (2,) f32 = [b0, b1]
    # x_ref : VMEM (Bt, 2*S) f32 block of x.reshape(B, Fin*S)
    # o_ref : VMEM (4, Bt) f32 block: rows [g00, g01, g01, g11], B on lanes
    S = x_ref.shape[1] // 2

    # Static lane slices (no DMA, no wrapper transpose).  When S % 128 != 0
    # the second slice costs one lane-rotate on the otherwise-idle XLU.
    x0 = x_ref[:, :S]                    # feature 0 over seq, (Bt, S)
    x1 = x_ref[:, S:]                    # feature 1 over seq, (Bt, S)

    w00 = w_ref[0]
    w01 = w_ref[1]
    w10 = w_ref[2]
    w11 = w_ref[3]
    b0 = b_ref[0]
    b1 = b_ref[1]

    # Linear(2, 2) as broadcast FMAs on the VPU (matches x @ W.T + b).
    v2_0 = x0 * w00 + x1 * w01 + b0      # (Bt, S)
    v2_1 = x0 * w10 + x1 * w11 + b1      # (Bt, S)

    # relu(tanh(v2) + v2) -- tanh runs on the EUP slot, f32 throughout.
    v4_0 = jnp.maximum(jnp.tanh(v2_0) + v2_0, 0.0)
    v4_1 = jnp.maximum(jnp.tanh(v2_1) + v2_1, 0.0)

    # Symmetric 2x2 Gram over S: only 3 distinct entries (g01 computed once).
    g00 = jnp.sum(v4_0 * v4_0, axis=-1, keepdims=True)   # (Bt, 1)
    g01 = jnp.sum(v4_0 * v4_1, axis=-1, keepdims=True)   # (Bt, 1)
    g11 = jnp.sum(v4_1 * v4_1, axis=-1, keepdims=True)   # (Bt, 1)

    # Reorient to lane-dense rows: one tiny XLU transpose per distinct entry,
    # then plain (unmasked once Bt >= 128) row stores.
    g00_row = jnp.transpose(g00)         # (1, Bt)
    g01_row = jnp.transpose(g01)         # (1, Bt)
    g11_row = jnp.transpose(g11)         # (1, Bt)

    o_ref[0:1, :] = g00_row
    o_ref[1:2, :] = g01_row
    o_ref[2:3, :] = g01_row
    o_ref[3:4, :] = g11_row


def _pick_block_b(B, S, block_b=None):
    """Batch tile size: ~4 MiB per input buffer, lane-aligned when tiling."""
    if block_b is None:
        budget_bytes = 4 * 1024 * 1024            # per buffer (x2 double-buffered)
        block_b = max(8, budget_bytes // (2 * S * 4))
    if block_b >= B:
        return B                                  # single block along batch
    # When actually tiling, the (4, Bt) output block needs Bt % 128 == 0.
    return max(128, (block_b // 128) * 128)


def model_forward(x, weight, bias, *, block_b=None):
    """x: (B, Fin=2, S), weight: (Fout=2, Fin=2), bias: (2,) -> (B, 2, 2)."""
    B, Fin, S = x.shape
    Fout = weight.shape[0]
    assert Fin == 2 and Fout == 2, "module is fixed to Linear(2, 2)"

    # Free views only -- no HBM round-trips before the kernel.
    x2d = x.reshape(B, Fin * S).astype(jnp.float32)        # contiguous reshape
    w_flat = weight.reshape(-1).astype(jnp.float32)        # (4,)
    b_flat = bias.reshape(-1).astype(jnp.float32)          # (2,)

    bt = _pick_block_b(B, S, block_b)
    num_blocks = pl.cdiv(B, bt)

    flops = B * S * 18                                      # FMAs + adds + relu + Gram
    bytes_accessed = (x2d.size + w_flat.size + b_flat.size + 4 * B) * 4
    cost = pl.CostEstimate(
        flops=flops,
        transcendentals=2 * B * S,
        bytes_accessed=bytes_accessed,
    )

    out_packed = pl.pallas_call(
        _model_kernel,
        out_shape=jax.ShapeDtypeStruct((4, B), jnp.float32),
        grid=(num_blocks,),
        in_specs=[
            pl.BlockSpec(memory_space=pltpu.MemorySpace.SMEM),      # weight (4,)
            pl.BlockSpec(memory_space=pltpu.MemorySpace.SMEM),      # bias   (2,)
            pl.BlockSpec((bt, Fin * S), lambda i: (i, 0)),          # x block
        ],
        out_specs=pl.BlockSpec((4, bt), lambda i: (0, i)),          # lane-dense
        compiler_params=pltpu.CompilerParams(
            dimension_semantics=("parallel",),                      # megacore on v7x
        ),
        cost_estimate=cost,
    )(w_flat, b_flat, x2d)

    # Rows [g00, g01, g01, g11] -> (B, 2, 2); tiny wrapper-side reshuffle.
    out = jnp.transpose(out_packed.reshape(Fout, Fout, B), (2, 0, 1))
    return out.astype(x.dtype)


def model_forward_ref(x, weight, bias):
    # Pure-JAX reference mirroring the PyTorch module exactly.
    v1 = jnp.transpose(x, (0, 2, 1))                   # (B, S, Fin)
    v2 = v1 @ weight.T + bias                          # (B, S, Fout)
    v3 = jnp.tanh(v2)
    v4 = jax.nn.relu(v3 + v2)
    x2 = jnp.transpose(v4, (0, 2, 1))                  # (B, Fout, S)
    return jnp.matmul(x2, v4)                          # (B, Fout, Fout)


if __name__ == "__main__":
    key = jax.random.PRNGKey(0)
    kx, kw, kb, kx2, kx3 = jax.random.split(key, 5)

    weight = jax.random.normal(kw, (2, 2), dtype=jnp.float32) * 0.5
    bias = jax.random.normal(kb, (2,), dtype=jnp.float32) * 0.1

    # Small shape: batch=2, seq=8 (single-block grid).
    x = jax.random.normal(kx, (2, 2, 8), dtype=jnp.float32)
    out = jax.block_until_ready(model_forward(x, weight, bias))
    ref = model_forward_ref(x, weight, bias)
    assert out.shape == (2, 2, 2)
    assert jnp.allclose(out, ref, atol=1e-5, rtol=1e-5), "mismatch vs reference"

    # Exact shape from the PyTorch spec: (1, 2, 2).
    x_spec = jax.random.normal(kx2, (1, 2, 2), dtype=jnp.float32)
    out2 = jax.block_until_ready(model_forward(x_spec, weight, bias))
    ref2 = model_forward_ref(x_spec, weight, bias)
    assert jnp.allclose(out2, ref2, atol=1e-5, rtol=1e-5), "mismatch (spec shape)"

    # Exercise the tiled / pipelined path: 3 batch blocks incl. a partial one.
    x_big = jax.random.normal(kx3, (300, 2, 16), dtype=jnp.float32)
    out3 = jax.block_until_ready(model_forward(x_big, weight, bias, block_b=128))
    ref3 = model_forward_ref(x_big, weight, bias)
    assert jnp.allclose(out3, ref3, atol=1e-4, rtol=1e-4), "mismatch (tiled path)"

    print("KERNEL_OK")
</pallas_src>

<mosaic_0001>
module attributes {stable_mosaic.version = 11 : i64} {
  func.func @_model_kernel(%arg0: i32, %arg1: memref<4xf32, #tpu.memory_space<smem>>, %arg2: memref<2xf32, #tpu.memory_space<smem>>, %arg3: memref<2x16xf32, #tpu.memory_space<vmem>>, %arg4: memref<4x2xf32, #tpu.memory_space<vmem>>) attributes {dimension_semantics = [#tpu.dimension_semantics<parallel>], iteration_bounds = array<i64: 1>, scalar_prefetch = 0 : i64, scratch_operands = 0 : i64, tpu.core_type = #tpu.core_type<tc>, window_params = [{transform_indices = @transform_0, window_bounds = array<i64: 4>}, {transform_indices = @transform_1, window_bounds = array<i64: 2>}, {transform_indices = @transform_2, window_bounds = array<i64: 2, 16>}, {transform_indices = @transform_3, window_bounds = array<i64: 4, 2>}]} {
    %c0 = arith.constant 0 : index
    %c0_0 = arith.constant 0 : index
    %0 = vector.load %arg3[%c0, %c0_0] : memref<2x16xf32, #tpu.memory_space<vmem>>, vector<2x8xf32>
    %c0_1 = arith.constant 0 : index
    %c8 = arith.constant 8 : index
    %1 = vector.load %arg3[%c0_1, %c8] : memref<2x16xf32, #tpu.memory_space<vmem>>, vector<2x8xf32>
    %c0_2 = arith.constant 0 : index
    %2 = memref.load %arg1[%c0_2] : memref<4xf32, #tpu.memory_space<smem>>
    %c1 = arith.constant 1 : index
    %3 = memref.load %arg1[%c1] : memref<4xf32, #tpu.memory_space<smem>>
    %c2 = arith.constant 2 : index
    %4 = memref.load %arg1[%c2] : memref<4xf32, #tpu.memory_space<smem>>
    %c3 = arith.constant 3 : index
    %5 = memref.load %arg1[%c3] : memref<4xf32, #tpu.memory_space<smem>>
    %c0_3 = arith.constant 0 : index
    %6 = memref.load %arg2[%c0_3] : memref<2xf32, #tpu.memory_space<smem>>
    %c1_4 = arith.constant 1 : index
    %7 = memref.load %arg2[%c1_4] : memref<2xf32, #tpu.memory_space<smem>>
    %8 = vector.broadcast %2 : f32 to vector<2x8xf32>
    %9 = arith.mulf %0, %8 : vector<2x8xf32>
    %10 = vector.broadcast %3 : f32 to vector<2x8xf32>
    %11 = arith.mulf %1, %10 : vector<2x8xf32>
    %12 = arith.addf %9, %11 : vector<2x8xf32>
    %13 = vector.broadcast %6 : f32 to vector<2x8xf32>
    %14 = arith.addf %12, %13 : vector<2x8xf32>
    %15 = vector.broadcast %4 : f32 to vector<2x8xf32>
    %16 = arith.mulf %0, %15 : vector<2x8xf32>
    %17 = vector.broadcast %5 : f32 to vector<2x8xf32>
    %18 = arith.mulf %1, %17 : vector<2x8xf32>
    %19 = arith.addf %16, %18 : vector<2x8xf32>
    %20 = vector.broadcast %7 : f32 to vector<2x8xf32>
    %21 = arith.addf %19, %20 : vector<2x8xf32>
    %22 = math.tanh %14 : vector<2x8xf32>
    %23 = arith.addf %22, %14 : vector<2x8xf32>
    %cst = arith.constant 0.000000e+00 : f32
    %24 = vector.broadcast %cst : f32 to vector<2x8xf32>
    %25 = arith.maximumf %23, %24 : vector<2x8xf32>
    %26 = math.tanh %21 : vector<2x8xf32>
    %27 = arith.addf %26, %21 : vector<2x8xf32>
    %cst_5 = arith.constant 0.000000e+00 : f32
    %28 = vector.broadcast %cst_5 : f32 to vector<2x8xf32>
    %29 = arith.maximumf %27, %28 : vector<2x8xf32>
    %30 = arith.mulf %25, %25 : vector<2x8xf32>
    %cst_6 = arith.constant dense<0.000000e+00> : vector<2xf32>
    %31 = vector.multi_reduction <add>, %30, %cst_6 [1] : vector<2x8xf32> to vector<2xf32>
    %32 = vector.shape_cast %31 : vector<2xf32> to vector<2x1xf32>
    %33 = arith.mulf %25, %29 : vector<2x8xf32>
    %cst_7 = arith.constant dense<0.000000e+00> : vector<2xf32>
    %34 = vector.multi_reduction <add>, %33, %cst_7 [1] : vector<2x8xf32> to vector<2xf32>
    %35 = vector.shape_cast %34 : vector<2xf32> to vector<2x1xf32>
    %36 = arith.mulf %29, %29 : vector<2x8xf32>
    %cst_8 = arith.constant dense<0.000000e+00> : vector<2xf32>
    %37 = vector.multi_reduction <add>, %36, %cst_8 [1] : vector<2x8xf32> to vector<2xf32>
    %38 = vector.shape_cast %37 : vector<2xf32> to vector<2x1xf32>
    %39 = tpu.transpose %32, [1, 0] : vector<2x1xf32> -> vector<1x2xf32>
    %40 = tpu.transpose %35, [1, 0] : vector<2x1xf32> -> vector<1x2xf32>
    %41 = tpu.transpose %38, [1, 0] : vector<2x1xf32> -> vector<1x2xf32>
    %c0_9 = arith.constant 0 : index
    %c0_10 = arith.constant 0 : index
    %42 = vector.load %arg4[%c0_9, %c0_10] : memref<4x2xf32, #tpu.memory_space<vmem>>, vector<1x2xf32>
    tpu.vector_store %arg4[%c0_9, %c0_10], %39 {strides = array<i32>} : memref<4x2xf32, #tpu.memory_space<vmem>>, vector<1x2xf32>,
    %c1_11 = arith.constant 1 : index
    %c0_12 = arith.constant 0 : index
    %43 = vector.load %arg4[%c1_11, %c0_12] : memref<4x2xf32, #tpu.memory_space<vmem>>, vector<1x2xf32>
    tpu.vector_store %arg4[%c1_11, %c0_12], %40 {strides = array<i32>} : memref<4x2xf32, #tpu.memory_space<vmem>>, vector<1x2xf32>,
    %c2_13 = arith.constant 2 : index
    %c0_14 = arith.constant 0 : index
    %44 = vector.load %arg4[%c2_13, %c0_14] : memref<4x2xf32, #tpu.memory_space<vmem>>, vector<1x2xf32>
    tpu.vector_store %arg4[%c2_13, %c0_14], %40 {strides = array<i32>} : memref<4x2xf32, #tpu.memory_space<vmem>>, vector<1x2xf32>,
    %c3_15 = arith.constant 3 : index
    %c0_16 = arith.constant 0 : index
    %45 = vector.load %arg4[%c3_15, %c0_16] : memref<4x2xf32, #tpu.memory_space<vmem>>, vector<1x2xf32>
    tpu.vector_store %arg4[%c3_15, %c0_16], %41 {strides = array<i32>} : memref<4x2xf32, #tpu.memory_space<vmem>>, vector<1x2xf32>,
    return
  }
  func.func @transform_0(%arg0: i32) -> i32 {
    %c0_i32 = arith.constant 0 : i32
    %c0_i32_0 = arith.constant 0 : i32
    return %c0_i32 : i32
  }
  func.func @transform_1(%arg0: i32) -> i32 {
    %c0_i32 = arith.constant 0 : i32
    %c0_i32_0 = arith.constant 0 : i32
    return %c0_i32 : i32
  }
  func.func @transform_2(%arg0: i32) -> (i32, i32) {
    %c0_i32 = arith.constant 0 : i32
    %c0_i32_0 = arith.constant 0 : i32
    return %arg0, %c0_i32 : i32, i32
  }
  func.func @transform_3(%arg0: i32) -> (i32, i32) {
    %c0_i32 = arith.constant 0 : i32
    %c0_i32_0 = arith.constant 0 : i32
    return %c0_i32, %arg0 : i32, i32
  }
}

</mosaic_0001>

<bundles_post_ra>
// kernel: tpu_custom_call.1
= control target key start
LH: loop header
LB: loop body
LE: loop exit
PB: predicated region body
PF: predicated region fallthrough
CT: control target
= control target key end

     0   :  { %8 = vsyncpa [#allocation3], 0  ;;  %s272_s0 = inlined_call_operand.hbm [shape: f32[4], index: 0, kind: input, shape index: {}]   ;;  %s273_s1 = inlined_call_operand.vmem [shape: f32[2], index: 1, kind: input, shape index: {}]   ;;  %s274_s2 = inlined_call_operand.vmem [shape: f32[2,16], index: 2, kind: input, shape index: {}]   ;;  %s275_s3 = inlined_call_operand.vmem [shape: f32[4,2], index: 3, kind: output, shape index: {}]  }
   0x1   :  { %9 = vsyncpa [#allocation4], 0  ;;  %s24_s14 = sshll.u32 %s273_s1, 4  ;;  %s228_s15 = smov [#allocation2]   ;;  %s25_s14 = int_to_ptr.vmem [resolvable:$true] %s24_s14 }
   0x2   :  { %17 = dma.hbm_to_smem %s272_s0, 16, %s228_s15, [#allocation3]  }
   0x3   :  { %s212_s18 = scalar_lea.vmem %s25_s14, 16  ;;  %p217_p1 = scmp.lt.s32.totalorder %s25_s14, %s25_s14 }
   0x4   :  { %p213_p0 = scmp.ne.s32.totalorder %s25_s14, %s212_s18  ;;  %p218_p2 = scmp.lt.s32.totalorder %s212_s18, %s212_s18 }
   0x6   :  { %p219_p3 = por %p218_p2, %p217_p1 }
   0x8   :  { %p220_p4 = pnand %p219_p3, %p213_p0 }
   0xa   :  { %223 = shalt.err (!%p220_p4)
}
   0xb   :  { %s229_s19 = smov [#allocation5]  }
   0xc   :  { %27 = dma.vmem_to_smem %s25_s14, 16, %s229_s19, [#allocation4]  }
   0xd   :  { %224 = dma.done.wait [#allocation3], 16  }
   0xe   :  { %225 = vsyncadd [#allocation3], 4294967280 }
   0xf   :  { %226 = dma.done.wait [#allocation4], 16  }
  0x10   :  { %227 = vsyncadd [#allocation4], 4294967280 }
  0x11   :  { %36 = sfence }
  0x12   :  { %s192_s1 = sld [smem:[#allocation2 + $0x1]]  ;;  %v37_v0 = vld [vmem:[%s274_s2] sm:$0x3]  ;;  %s230_s0 = smov 120   ;;  %vm73_vm0 = vcmask 58368   ;;  %vm181_vm1 = vcmask 8192  }
  0x13   :  { %s194_s20 = sld [smem:[#allocation2 + $0x3]] }
  0x14   :  { %s38_s23 = sld [smem:[#allocation2]] }
  0x15   :  { %s193_s24 = sld [smem:[#allocation2 + $0x2]] }
  0x16   :  { %s42_s25 = sld [smem:[#allocation5]] }
  0x17   :  { %s195_s26 = sld [smem:[#allocation5 + $0x1]] }
  0x18   :  { %v46_v1 = vstv %s192_s1 }
  0x19   :  { %v47_v2 = vmul.f32 %v46_v1, %v37_v0  ;;  %v57_v3 = vstv %s194_s20 }
  0x1a   :  { %v58_v4 = vmul.f32 %v57_v3, %v37_v0  ;;  %v44_v5 = vstv %s38_s23 }
  0x1b   :  { %49 = vrot.lane.b32.xlu0 %v47_v2, %s230_s0  ;;  %v45_v6 = vmul.f32 %v44_v5, %v37_v0  ;;  %v55_v7 = vstv %s193_s24 }
  0x1c   :  { %v53_v8 = vstv %s42_s25  ;;  %v56_v11 = vmul.f32 %v55_v7, %v37_v0 }
  0x1d   :  { %v64_v13 = vstv %s195_s26 }
  0x1f   :  { %60 = vrot.lane.b32.xlu0 %v58_v4, %s230_s0 }
  0x8d   :  { %v50_v9 = vpop.permute.xlu0 %49 }
  0x8e   :  { %v52_v10 = vadd.f32 %v50_v9, %v45_v6 }
  0x90   :  { %v54_v12 = vadd.f32 %v53_v8, %v52_v10 }
  0x91   :  { %v61_v14 = vpop.permute.xlu0 %60 }
  0x92   :  { %200 = vtanh.f32 %v54_v12  ;;  %v63_v15 = vadd.f32 %v61_v14, %v56_v11 }
  0x94   :  { %v65_v16 = vadd.f32 %v64_v13, %v63_v15 }
  0x96   :  { %202 = vtanh.f32 %v65_v16 }
  0x9f   :  { %v201_v17 = vpop.eup %200 }
  0xa0   :  { %v67_v18 = vadd.f32 %v201_v17, %v54_v12 }
  0xa2   :  { %v68_v19 = vmax.f32 %v67_v18, 0.0 }
  0xa3   :  { %v203_v20 = vpop.eup %202 }
  0xa4   :  { %v70_v21 = vadd.f32 %v203_v20, %v65_v16  ;;  %v72_v22 = vmul.f32 %v68_v19, %v68_v19 }
  0xa6   :  { %v74_v23 = vsel %vm73_vm0, %v72_v22, 0.0  ;;  %v71_v24 = vmax.f32 %v70_v21, 0.0 }
  0xa7   :  { %75 = vadd.xlane.f32.xlu1 %v74_v23 }
  0xa8   :  { %v81_v25 = vmul.f32 %v71_v24, %v71_v24  ;;  %v77_v26 = vmul.f32 %v71_v24, %v68_v19 }
  0xaa   :  { %v82_v27 = vsel %vm73_vm0, %v81_v25, 0.0  ;;  %v78_v28 = vsel %vm73_vm0, %v77_v26, 0.0 }
  0xab   :  { %83 = vadd.xlane.f32.xlu0 %v82_v27  ;;  %79 = vadd.xlane.f32.xlu1 %v78_v28 }
 0x130   :  { %v76_v29 = vpop.xlane.xlu1 %75 }
 0x131   :  { %85 = vxpose.xlu1.b32.start.end [1/1] (short) (narrow) %v76_v29, 8 }
 0x134   :  { %v84_v30 = vpop.xlane.xlu0 %83  ;;  %v80_v31 = vpop.xlane.xlu1 %79 }
 0x135   :  { %149 = vxpose.xlu1.b32.start.end [1/1] (short) (narrow) %v84_v30, 8  ;;  %117 = vxpose.xlu0.b32.start.end [1/1] (short) (narrow) %v80_v31, 8 }
 0x1ad   :  { %v101_v32 = vpop.trf.xlu1 }
 0x1ae   :  { %182 = vst.msk [vmem:[%s275_s3] sm:$0x1] %vm181_vm1, %v101_v32 }
 0x1b1   :  { %v133_v33 = vpop.trf.xlu0  ;;  %v165_v34 = vpop.trf.xlu1 }
 0x1b2   :  { %183 = vst.msk [vmem:[%s275_s3 + $0x1] sm:$0x1] %vm181_vm1, %v133_v33  ;;  %184 = vst.msk [vmem:[%s275_s3 + $0x2] sm:$0x1] %vm181_vm1, %v133_v33 }
 0x1b3   :  { %185 = vst.msk [vmem:[%s275_s3 + $0x3] sm:$0x1] %vm181_vm1, %v165_v34 }
 0x1b4   :  { %190 = vsyncpa [#allocation3], 1 }
 0x1b5   :  { %191 = vsyncpa [#allocation4], 1 }

</bundles_post_ra>
